<compile_context>
chip_gen: v5e
topology: v5e:2x2
jax: 0.10.0
libtpu: 0.0.40
codegen_flags: <defaults>
</compile_context>

<pallas_src>
import functools
import math

import jax
import jax.numpy as jnp
from jax.experimental import pallas as pl
from jax.experimental.pallas import tpu as pltpu


def _cdiv(a, b):
    return -(-a // b)


def _gbn_kernel(x_ref, gamma_ref, beta_ref, out_ref, *, eps, axis):
    """Normalize each ghost batch; the reduction runs along `axis` of the block."""
    x = x_ref[...]
    # f32-accumulated mean straight from the native-dtype tile.
    mean = jnp.mean(x, axis=axis, keepdims=True, dtype=jnp.float32)
    # Two-pass biased variance (matches BatchNorm1d; avoids cancellation).
    xc = x.astype(jnp.float32) - mean
    var = jnp.mean(xc * xc, axis=axis, keepdims=True)
    scale = gamma_ref[...] * jax.lax.rsqrt(var + eps)
    out_ref[...] = (xc * scale + beta_ref[...]).astype(out_ref.dtype)


def _vmem_capacity_bytes():
    try:
        cap = getattr(pltpu.get_tpu_info(), "vmem_capacity_bytes", None)
        if cap:
            return int(cap)
    except Exception:
        pass
    return 64 * 1024 * 1024  # conservative default (v7x per-TensorCore VMEM)


def _plan_groups(n_chunks, bytes_per_chunk, unit, budget_bytes):
    """Pick (ghost batches per grid step, grid length).

    `unit` = smallest group whose lane width is a multiple of 128 (1 for the
    already-lane-dense path). The group is VMEM-capped, and we aim for >= 4
    (even) grid steps so the DMA pipeline has work to overlap and both v7x
    TensorCores are fed.
    """
    # TODO(synk): a single ghost batch larger than the VMEM budget would need a
    # two-phase (stats then normalize) kernel; not handled here.
    if n_chunks <= unit:
        # Single full-extent block (block dim == array dim, so no 128-lane
        # alignment requirement). Too little data to pipeline anyway.
        return n_chunks, 1
    g_vmem = max((budget_bytes // max(bytes_per_chunk, 1)) // unit * unit, unit)
    grid = max(_cdiv(n_chunks, g_vmem), 4)
    grid = min(grid, _cdiv(n_chunks, unit))
    if grid > 1 and grid % 2 == 1:
        grid = min(grid + 1, _cdiv(n_chunks, unit))
    g = _cdiv(_cdiv(n_chunks, grid), unit) * unit
    grid = _cdiv(n_chunks, g)
    return g, grid


def gbn_forward(x, gamma, beta, *, virtual_batch_size=128, eps=1e-5):
    """Ghost Batch Norm forward (training-mode batch statistics)."""
    batch, d = x.shape
    n_chunks = max(batch // virtual_batch_size, 1)
    # TODO(synk): torch.chunk tolerates a ragged last virtual batch; this
    # kernel requires the batch to split evenly into n_chunks.
    assert batch % n_chunks == 0, "batch must split evenly into ghost batches"
    vb = batch // n_chunks

    # Generation-aware VMEM budget: raise Mosaic's scoped limit and size tiles
    # against it (double-buffered in/out DMA buffers + ~12 B/elt f32 temps).
    cap = _vmem_capacity_bytes()
    vmem_limit = max(min(int(cap * 0.75), cap - (8 << 20)), 16 << 20)
    budget = int(vmem_limit * 0.85)
    itemsize = x.dtype.itemsize
    bytes_per_chunk = vb * d * (4 * itemsize + 12)

    gamma_f = gamma.astype(jnp.float32).reshape(-1)
    beta_f = beta.astype(jnp.float32).reshape(-1)
    compiler_params = pltpu.CompilerParams(
        dimension_semantics=("parallel",),  # groups are independent -> megacore split
        vmem_limit_bytes=int(vmem_limit),
    )
    x3 = x.reshape(n_chunks, vb, d)

    if d % 128 == 0:
        # Features already fill whole vregs: stream (G, vb, D) slabs directly.
        g, grid = _plan_groups(n_chunks, bytes_per_chunk, 1, budget)
        n_pad = g * grid
        if n_pad != n_chunks:
            x3 = jnp.pad(x3, ((0, n_pad - n_chunks), (0, 0), (0, 0)))
        out = pl.pallas_call(
            functools.partial(_gbn_kernel, eps=eps, axis=1),
            out_shape=jax.ShapeDtypeStruct((n_pad, vb, d), x.dtype),
            grid_spec=pltpu.PrefetchScalarGridSpec(
                num_scalar_prefetch=0,
                grid=(grid,),
                in_specs=[
                    pl.BlockSpec((g, vb, d), lambda i: (i, 0, 0)),
                    pl.BlockSpec((1, 1, d), lambda i: (0, 0, 0)),
                    pl.BlockSpec((1, 1, d), lambda i: (0, 0, 0)),
                ],
                out_specs=pl.BlockSpec((g, vb, d), lambda i: (i, 0, 0)),
            ),
            compiler_params=compiler_params,
        )(x3, gamma_f.reshape(1, 1, d), beta_f.reshape(1, 1, d))
        return out[:n_chunks].reshape(batch, d)

    # Small / unaligned D (typical TabNet): lane-dense relayout. Ghost batches
    # are concatenated along the lane axis -> (vb, n_chunks*D); each lane is a
    # unique (chunk, feature) pair, so the sublane reduction yields per-chunk
    # statistics for free and every load/store is full-lane.
    unit = 128 // math.gcd(d, 128)  # chunks per 128-lane-aligned tile
    g, grid = _plan_groups(n_chunks, bytes_per_chunk, unit, budget)
    n_pad = g * grid
    if n_pad != n_chunks:
        x3 = jnp.pad(x3, ((0, n_pad - n_chunks), (0, 0), (0, 0)))
    x2 = x3.transpose(1, 0, 2).reshape(vb, n_pad * d)
    gamma2 = jnp.tile(gamma_f, n_pad).reshape(1, n_pad * d)
    beta2 = jnp.tile(beta_f, n_pad).reshape(1, n_pad * d)
    lanes = g * d  # lane width per grid step (multiple of 128 or full width)

    out2 = pl.pallas_call(
        functools.partial(_gbn_kernel, eps=eps, axis=0),
        out_shape=jax.ShapeDtypeStruct((vb, n_pad * d), x.dtype),
        grid_spec=pltpu.PrefetchScalarGridSpec(
            num_scalar_prefetch=0,
            grid=(grid,),
            in_specs=[
                pl.BlockSpec((vb, lanes), lambda i: (0, i)),
                pl.BlockSpec((1, lanes), lambda i: (0, i)),
                pl.BlockSpec((1, lanes), lambda i: (0, i)),
            ],
            out_specs=pl.BlockSpec((vb, lanes), lambda i: (0, i)),
        ),
        compiler_params=compiler_params,
    )(x2, gamma2, beta2)

    out = out2.reshape(vb, n_pad, d).transpose(1, 0, 2)[:n_chunks]
    return out.reshape(batch, d)


def gbn_reference(x, gamma, beta, virtual_batch_size, eps=1e-5):
    """Pure-JAX reference matching PyTorch GBN (training mode)."""
    batch, d = x.shape
    n_chunks = max(batch // virtual_batch_size, 1)
    xs = x.reshape(n_chunks, -1, d).astype(jnp.float32)
    mean = xs.mean(axis=1, keepdims=True)
    var = jnp.mean(jnp.square(xs - mean), axis=1, keepdims=True)
    y = (xs - mean) * jax.lax.rsqrt(var + eps) * gamma + beta
    return y.reshape(batch, d).astype(x.dtype)


if __name__ == "__main__":
    key = jax.random.PRNGKey(0)
    kx, kg, kb = jax.random.split(key, 3)

    def check(batch, input_dim, vbs):
        x = jax.random.normal(kx, (batch, input_dim), jnp.float32)
        # Non-trivial affine params to exercise the gamma/beta path.
        gamma = 1.0 + 0.1 * jax.random.normal(kg, (input_dim,), jnp.float32)
        beta = 0.1 * jax.random.normal(kb, (input_dim,), jnp.float32)
        out = jax.block_until_ready(
            gbn_forward(x, gamma, beta, virtual_batch_size=vbs))
        ref = gbn_reference(x, gamma, beta, vbs)
        assert out.shape == x.shape and out.dtype == x.dtype
        assert jnp.allclose(out, ref, atol=1e-4, rtol=1e-4), (batch, input_dim, vbs)

    # TODO(synk): running_mean/running_var momentum update and the eval-mode
    # (running-stats) path of BatchNorm1d are not implemented; this kernel
    # reproduces the training-mode forward output only.
    check(32, 16, 8)    # lane-dense path, small TabNet-like shape
    check(80, 16, 8)    # lane-dense path with chunk padding + 2 grid steps
    check(32, 128, 8)   # D already a multiple of 128: direct grouped path
    print("KERNEL_OK")
</pallas_src>

<mosaic_0001>
module attributes {stable_mosaic.version = 11 : i64} {
  func.func @_gbn_kernel(%arg0: i32, %arg1: memref<8x64xf32, #tpu.memory_space<vmem>>, %arg2: memref<1x64xf32, #tpu.memory_space<vmem>>, %arg3: memref<1x64xf32, #tpu.memory_space<vmem>>, %arg4: memref<8x64xf32, #tpu.memory_space<vmem>>) attributes {dimension_semantics = [#tpu.dimension_semantics<parallel>], iteration_bounds = array<i64: 1>, scalar_prefetch = 0 : i64, scratch_operands = 0 : i64, tpu.core_type = #tpu.core_type<tc>, window_params = [{transform_indices = @transform_0, window_bounds = array<i64: 8, 64>}, {transform_indices = @transform_1, window_bounds = array<i64: 1, 64>}, {transform_indices = @transform_2, window_bounds = array<i64: 1, 64>}, {transform_indices = @transform_3, window_bounds = array<i64: 8, 64>}]} {
    %c0 = arith.constant 0 : index
    %c0_0 = arith.constant 0 : index
    %0 = vector.load %arg1[%c0, %c0_0] : memref<8x64xf32, #tpu.memory_space<vmem>>, vector<8x64xf32>
    %cst = arith.constant dense<0.000000e+00> : vector<64xf32>
    %1 = vector.multi_reduction <add>, %0, %cst [0] : vector<8x64xf32> to vector<64xf32>
    %2 = vector.shape_cast %1 : vector<64xf32> to vector<1x64xf32>
    %cst_1 = arith.constant 8.000000e+00 : f32
    %3 = vector.broadcast %cst_1 : f32 to vector<1x64xf32>
    %4 = arith.divf %2, %3 : vector<1x64xf32>
    %5 = vector.broadcast %4 : vector<1x64xf32> to vector<8x64xf32>
    %6 = arith.subf %0, %5 : vector<8x64xf32>
    %7 = arith.mulf %6, %6 : vector<8x64xf32>
    %cst_2 = arith.constant dense<0.000000e+00> : vector<64xf32>
    %8 = vector.multi_reduction <add>, %7, %cst_2 [0] : vector<8x64xf32> to vector<64xf32>
    %9 = vector.shape_cast %8 : vector<64xf32> to vector<1x64xf32>
    %cst_3 = arith.constant 8.000000e+00 : f32
    %10 = vector.broadcast %cst_3 : f32 to vector<1x64xf32>
    %11 = arith.divf %9, %10 : vector<1x64xf32>
    %c0_4 = arith.constant 0 : index
    %c0_5 = arith.constant 0 : index
    %12 = vector.load %arg2[%c0_4, %c0_5] : memref<1x64xf32, #tpu.memory_space<vmem>>, vector<1x64xf32>
    %cst_6 = arith.constant 9.99999974E-6 : f32
    %13 = vector.broadcast %cst_6 : f32 to vector<1x64xf32>
    %14 = arith.addf %11, %13 : vector<1x64xf32>
    %15 = math.rsqrt %14 : vector<1x64xf32>
    %16 = arith.mulf %12, %15 : vector<1x64xf32>
    %17 = vector.broadcast %16 : vector<1x64xf32> to vector<8x64xf32>
    %18 = arith.mulf %6, %17 : vector<8x64xf32>
    %c0_7 = arith.constant 0 : index
    %c0_8 = arith.constant 0 : index
    %19 = vector.load %arg3[%c0_7, %c0_8] : memref<1x64xf32, #tpu.memory_space<vmem>>, vector<1x64xf32>
    %20 = vector.broadcast %19 : vector<1x64xf32> to vector<8x64xf32>
    %21 = arith.addf %18, %20 : vector<8x64xf32>
    %c0_9 = arith.constant 0 : index
    %c0_10 = arith.constant 0 : index
    %22 = vector.load %arg4[%c0_9, %c0_10] : memref<8x64xf32, #tpu.memory_space<vmem>>, vector<8x64xf32>
    tpu.vector_store %arg4[%c0_9, %c0_10], %21 {strides = array<i32>} : memref<8x64xf32, #tpu.memory_space<vmem>>, vector<8x64xf32>,
    return
  }
  func.func @transform_0(%arg0: i32) -> (i32, i32) {
    %c0_i32 = arith.constant 0 : i32
    %c0_i32_0 = arith.constant 0 : i32
    return %c0_i32, %arg0 : i32, i32
  }
  func.func @transform_1(%arg0: i32) -> (i32, i32) {
    %c0_i32 = arith.constant 0 : i32
    %c0_i32_0 = arith.constant 0 : i32
    return %c0_i32, %arg0 : i32, i32
  }
  func.func @transform_2(%arg0: i32) -> (i32, i32) {
    %c0_i32 = arith.constant 0 : i32
    %c0_i32_0 = arith.constant 0 : i32
    return %c0_i32, %arg0 : i32, i32
  }
  func.func @transform_3(%arg0: i32) -> (i32, i32) {
    %c0_i32 = arith.constant 0 : i32
    %c0_i32_0 = arith.constant 0 : i32
    return %c0_i32, %arg0 : i32, i32
  }
}

</mosaic_0001>

<bundles_post_ra>
// kernel: tpu_custom_call.1
= control target key start
LH: loop header
LB: loop body
LE: loop exit
PB: predicated region body
PF: predicated region fallthrough
CT: control target
= control target key end

     0   :  { %8 = vsyncpa [#allocation3], 0  ;;  %s237_s0 = inlined_call_operand.hbm [shape: f32[8,64], index: 0, kind: input, shape index: {}]   ;;  %s238_s1 = inlined_call_operand.hbm [shape: f32[1,64], index: 1, kind: input, shape index: {}]   ;;  %s239_s2 = inlined_call_operand.vmem [shape: f32[1,64], index: 2, kind: input, shape index: {}]   ;;  %s240_s3 = inlined_call_operand.hbm [shape: f32[8,64], index: 3, kind: output, shape index: {}]  }
   0x1   :  { %9 = vsyncpa [#allocation6], 0 }
   0x2   :  { %10 = vsyncpa [#allocation4], 0  ;;  %s16_s14 = sshll.u32 %s237_s0, 4  ;;  %s198_s15 = smov [#allocation2]   ;;  %s17_s14 = int_to_ptr.hbm [resolvable:$true] %s16_s14 }
   0x3   :  { %s18_s16 = sshll.u32 %s198_s15, 4  ;;  %s27_s19 = sshll.u32 %s238_s1, 4  ;;  %s19_s16 = int_to_ptr.vmem [resolvable:$true] %s18_s16  ;;  %s28_s19 = int_to_ptr.hbm [resolvable:$true] %s27_s19 }
   0x4   :  { %21 = dma.hbm_to_vmem [thread:$0]  %s17_s14, 128, %s19_s16, [#allocation3]  }
   0x5   :  { %s199_s20 = smov [#allocation5]  }
   0x6   :  { %s29_s21 = sshll.u32 %s199_s20, 4  ;;  %s30_s21 = int_to_ptr.vmem [resolvable:$true] %s29_s21 }
   0x7   :  { %32 = dma.hbm_to_vmem [thread:$0]  %s28_s19, 16, %s30_s21, [#allocation6]  }
   0x8   :  { %192 = dma.done.wait [#allocation3], 128  }
   0x9   :  { %193 = vsyncadd [#allocation3], 4294967168 }
   0xa   :  { %194 = dma.done.wait [#allocation6], 16  }
   0xb   :  { %195 = vsyncadd [#allocation6], 4294967280  ;;  %v200_v0 = vmov 8.0   ;;  %vm44_vm0 = vcmask 523264   ;;  %v43_v2 = vld [vmem:[#allocation2] sm:$0xff]  ;;  %s201_s22 = smov [#allocation7]  }
   0xc   :  { %116 = vrcp.f32 %v200_v0  ;;  %v45_v3 = vsel %vm44_vm0, %v43_v2, 0.0  ;;  %v70_v32 = vld [vmem:[#allocation5] sm:$0x1]  ;;  %v115_v37 = vld [vmem:[%s239_s2] ss:$0 sm:$0xff]  ;;  %s98_s23 = sshll.u32 %s201_s22, 4  ;;  %s99_s23 = int_to_ptr.vmem [resolvable:$true] %s98_s23 }
   0xd   :  { %v46_v5 = vrot.slane %v45_v3, 4  ;;  %s100_s26 = sshll.u32 %s240_s3, 4  ;;  %s101_s26 = int_to_ptr.hbm [resolvable:$true] %s100_s26 }
   0xf   :  { %v47_v7 = vadd.f32 %v46_v5, %v45_v3 }
  0x11   :  { %v48_v9 = vrot.slane %v47_v7, 2 }
  0x12   :  { %v117_v1 = vpop.eup %116 }
  0x13   :  { %v53_v4 = vmul.f32 8.0, %v117_v1  ;;  %v49_v11 = vadd.f32 %v48_v9, %v47_v7  ;;  %vm57_vm1 = vweird.f32 %v117_v1 }
  0x15   :  { %v54_v6 = vsub.f32 1.0, %v53_v4  ;;  %v50_v12 = vrot.slane %v49_v11, 1 }
  0x17   :  { %v55_v8 = vmul.f32 %v117_v1, %v54_v6  ;;  %v51_v14 = vadd.f32 %v50_v12, %v49_v11 }
  0x19   :  { %v56_v10 = vadd.f32 %v117_v1, %v55_v8 }
  0x1b   :  { %v58_v13 = vsel %vm57_vm1, %v117_v1, %v56_v10 }
  0x1c   :  { %v59_v15 = vmul.f32 %v58_v13, %v51_v14 }
  0x1e   :  { %v60_v16 = vsub.f32 %v43_v2, %v59_v15 }
  0x20   :  { %v61_v17 = vmul.f32 %v60_v16, %v60_v16 }
  0x22   :  { %v62_v18 = vsel %vm44_vm0, %v61_v17, 0.0 }
  0x23   :  { %v63_v19 = vrot.slane %v62_v18, 4 }
  0x25   :  { %v64_v20 = vadd.f32 %v63_v19, %v62_v18 }
  0x27   :  { %v65_v21 = vrot.slane %v64_v20, 2 }
  0x29   :  { %v66_v22 = vadd.f32 %v65_v21, %v64_v20 }
  0x2b   :  { %v67_v23 = vrot.slane %v66_v22, 1 }
  0x2d   :  { %v68_v24 = vadd.f32 %v67_v23, %v66_v22 }
  0x2f   :  { %v69_v25 = vmul.f32 %v68_v24, %v58_v13 }
  0x31   :  { %v71_v26 = vadd.f32 1e-05, %v69_v25 }
  0x33   :  { %118 = vrsqrt.f32 %v71_v26  ;;  %vm78_vm2 = vweird.f32 %v71_v26 }
  0x39   :  { %v119_v27 = vpop.eup %118 }
  0x3a   :  { %v73_v28 = vmul.f32 %v119_v27, %v71_v26  ;;  %vm79_vm3 = vweird.f32 %v119_v27 }
  0x3b   :  { %vm80_vm4 = vmor %vm78_vm2, %vm79_vm3 }
  0x3c   :  { %v74_v29 = vmul.f32 %v119_v27, %v73_v28 }
  0x3e   :  { %v75_v30 = vmul.f32 0.5, %v74_v29 }
  0x40   :  { %v76_v31 = vsub.f32 1.5, %v75_v30 }
  0x42   :  { %v77_v33 = vmul.f32 %v119_v27, %v76_v31 }
  0x44   :  { %v81_v34 = vsel %vm80_vm4, %v119_v27, %v77_v33 }
  0x45   :  { %v82_v35 = vmul.f32 %v81_v34, %v70_v32 }
  0x47   :  { %v84_v36 = vperm.slane %v82_v35, 0 }
  0x49   :  { %v86_v38 = vmul.f32 %v84_v36, %v60_v16 }
  0x4b   :  { %v91_v39 = vadd.f32 %v115_v37, %v86_v38 }
  0x4d   :  { %92 = vst.msk [vmem:[#allocation7] sm:$0xff] %vm44_vm0, %v91_v39 }
  0x4e   :  { %103 = dma.vmem_to_hbm [thread:$0]  %s99_s23, 128, %s101_s26, [#allocation4]  }
  0x4f   :  { %196 = dma.done.wait [#allocation4], 128  }
  0x50   :  { %197 = vsyncadd [#allocation4], 4294967168 }
  0x51   :  { %108 = vsyncpa [#allocation3], 1 }
  0x52   :  { %109 = vsyncpa [#allocation6], 1 }
  0x53   :  { %110 = vsyncpa [#allocation4], 1 }

</bundles_post_ra>
